<compile_context>
chip_gen: v6e
topology: v6e:2x2x1
jax: 0.10.0
libtpu: 0.0.40
codegen_flags: <defaults>
</compile_context>

<pallas_src>
import functools

import jax
import jax.numpy as jnp
from jax.experimental import pallas as pl
from jax.experimental.pallas import tpu as pltpu


def _round_up(x, m):
    return ((x + m - 1) // m) * m


def _cca_loss_kernel(outputs_t_ref, y_ref, loss_ref, *, coefficient, num_base_classes):
    """Fused split + per-sample cross-entropy (logsumexp - label logit) + distance term.

    outputs_t_ref : VMEM [C+1, tile_n]  logits, classes on sublanes, batch on lanes
    y_ref         : VMEM [1, tile_n]    int32 labels
    loss_ref      : VMEM [1, tile_n]    float32 per-sample loss
    """
    C = num_base_classes
    raw = outputs_t_ref[...]                        # native dtype (bf16 stays narrow over DMA)
    base = raw[:C, :].astype(jnp.float32)           # [C, tile_n]  class logits
    dist = raw[C:C + 1, :].astype(jnp.float32)      # [1, tile_n]  distances row

    # Numerically stable logsumexp over the class (sublane) axis.
    m = jnp.max(base, axis=0, keepdims=True)                             # [1, tile_n]
    lse = m + jnp.log(jnp.sum(jnp.exp(base - m), axis=0, keepdims=True))

    # Gather the label logit via a one-hot mask (no dynamic vector gather on TPU).
    y = y_ref[...]                                                       # [1, tile_n]
    rows = jax.lax.broadcasted_iota(jnp.int32, base.shape, 0)            # class id per sublane
    picked = jnp.sum(jnp.where(rows == y, base, 0.0), axis=0, keepdims=True)

    ce = lse - picked                                                    # per-sample CE
    loss_ref[...] = ce + jnp.float32(coefficient) * dist


def cca_loss(outputs, y, *, coefficient, tile_n=16384):
    """outputs: [N, C+1] (f32 or bf16), y: [N] int labels in [0, C) -> loss [N] f32."""
    N, Cp1 = outputs.shape
    C = Cp1 - 1

    # Batch tile: multiple of 128 (lane width); capped so small N stays one tile.
    tile_n = max(128, min(_round_up(tile_n, 128), _round_up(N, 128)))
    num_tiles = pl.cdiv(N, tile_n)
    n_pad = num_tiles * tile_n

    # Classes-on-sublanes layout.  TODO(synk): have the producer emit [C+1, N]
    # directly (or fuse this transpose upstream) to avoid the extra relayout pass.
    outputs_t = outputs.T                                   # [C+1, N]

    # Only the tiny label vector is padded (logits are never copied/padded).
    y_i32 = y.astype(jnp.int32)
    if n_pad != N:
        y_i32 = jnp.pad(y_i32, (0, n_pad - N))
    y2d = y_i32.reshape(num_tiles, tile_n)

    kernel = functools.partial(
        _cca_loss_kernel, coefficient=coefficient, num_base_classes=C
    )

    # VMEM budget: double-buffered pipeline blocks + in-kernel f32 temporaries.
    # Generalized so C+1 > 128 (large class counts) is still counted correctly.
    itemsize = jnp.dtype(outputs.dtype).itemsize
    sublane = 8 * max(1, 4 // itemsize)                     # 8 for f32, 16 for bf16
    cp1_pad = _round_up(Cp1, sublane)
    pipe_bytes = 2 * tile_n * (cp1_pad * itemsize + 8 * 4 + 8 * 4)   # logits + y + loss blocks
    temp_bytes = 4 * tile_n * _round_up(Cp1, 8) * 4                  # f32 base/exp/mask temps
    vmem_needed = pipe_bytes + temp_bytes + (4 << 20)
    try:
        phys_vmem = pltpu.get_tpu_info().vmem_capacity_bytes
    except Exception:
        phys_vmem = 64 << 20                                # v7x-safe fallback
    vmem_cap = max(32 << 20, min(phys_vmem - (12 << 20), 100 << 20))
    vmem_limit = int(min(max(vmem_needed, 32 << 20), vmem_cap))

    loss2d = pl.pallas_call(
        kernel,
        out_shape=jax.ShapeDtypeStruct((num_tiles, tile_n), jnp.float32),
        grid=(num_tiles,),
        in_specs=[
            pl.BlockSpec((Cp1, tile_n), lambda i: (0, i)),   # logits: classes on sublanes
            pl.BlockSpec((1, tile_n), lambda i: (i, 0)),     # labels: lane-dense row
        ],
        out_specs=pl.BlockSpec((1, tile_n), lambda i: (i, 0)),  # loss: lane-dense row
        compiler_params=pltpu.CompilerParams(
            # TODO(synk): on v7x, if xprof shows one idle TensorCore, switch this
            # axis to pltpu.CORE_PARALLEL (or a core_map) for ~2x.
            dimension_semantics=("parallel",),
            vmem_limit_bytes=vmem_limit,
        ),
    )(outputs_t, y2d)
    return loss2d.reshape(-1)[:N]


def _reference(outputs, y, coefficient):
    """Pure-JAX reference matching the PyTorch semantics."""
    C = outputs.shape[1] - 1
    out_f32 = outputs.astype(jnp.float32)
    base = out_f32[:, :C]
    dist = out_f32[:, C]
    lse = jax.nn.logsumexp(base, axis=-1)
    picked = jnp.take_along_axis(base, y[:, None], axis=-1)[:, 0]
    return (lse - picked) + coefficient * dist


if __name__ == "__main__":
    coefficient = 0.5
    k1, k2, k3, k4, k5, k6 = jax.random.split(jax.random.PRNGKey(0), 6)

    # 1) Small single-tile case, f32 (module's plain 2-D [N, C+1] layout).
    N, C = 8, 10
    outputs1 = jax.random.normal(k1, (N, C + 1), dtype=jnp.float32)
    y1 = jax.random.randint(k2, (N,), 0, C, dtype=jnp.int32)
    loss1 = cca_loss(outputs1, y1, coefficient=coefficient)
    jax.block_until_ready(loss1)
    ref1 = _reference(outputs1, y1, coefficient)
    assert loss1.shape == (N,)
    assert jnp.allclose(loss1, ref1, atol=1e-5, rtol=1e-5), (loss1, ref1)

    # 2) Multi-tile case with a partial last block (exercises grid / remainder path).
    N2, C2, tile = 200, 16, 128
    outputs2 = jax.random.normal(k3, (N2, C2 + 1), dtype=jnp.float32)
    y2 = jax.random.randint(k4, (N2,), 0, C2, dtype=jnp.int32)
    loss2 = cca_loss(outputs2, y2, coefficient=coefficient, tile_n=tile)
    jax.block_until_ready(loss2)
    ref2 = _reference(outputs2, y2, coefficient)
    assert loss2.shape == (N2,)
    assert jnp.allclose(loss2, ref2, atol=1e-5, rtol=1e-5), (loss2, ref2)

    # 3) bf16 input path (narrow DMA, f32 compute in VMEM).
    N3, C3 = 64, 32
    outputs3 = jax.random.normal(k5, (N3, C3 + 1), dtype=jnp.float32).astype(jnp.bfloat16)
    y3 = jax.random.randint(k6, (N3,), 0, C3, dtype=jnp.int32)
    loss3 = cca_loss(outputs3, y3, coefficient=coefficient)
    jax.block_until_ready(loss3)
    ref3 = _reference(outputs3, y3, coefficient)
    assert loss3.shape == (N3,)
    assert jnp.allclose(loss3, ref3, atol=1e-4, rtol=1e-4), (loss3, ref3)

    print("KERNEL_OK")
</pallas_src>

<mosaic_0001>
module attributes {stable_mosaic.version = 11 : i64} {
  func.func @_cca_loss_kernel(%arg0: i32, %arg1: memref<11x128xf32, #tpu.memory_space<vmem>>, %arg2: memref<1x128xi32, #tpu.memory_space<vmem>>, %arg3: memref<1x128xf32, #tpu.memory_space<vmem>>) attributes {dimension_semantics = [#tpu.dimension_semantics<parallel>], iteration_bounds = array<i64: 1>, scalar_prefetch = 0 : i64, scratch_operands = 0 : i64, tpu.core_type = #tpu.core_type<tc>, window_params = [{transform_indices = @transform_0, window_bounds = array<i64: 11, 128>}, {transform_indices = @transform_1, window_bounds = array<i64: 1, 128>}, {transform_indices = @transform_2, window_bounds = array<i64: 1, 128>}]} {
    %c0 = arith.constant 0 : index
    %c0_0 = arith.constant 0 : index
    %0 = vector.load %arg1[%c0, %c0_0] : memref<11x128xf32, #tpu.memory_space<vmem>>, vector<11x128xf32>
    %1 = vector.extract_strided_slice %0 {offsets = [0, 0], sizes = [10, 128], strides = [1, 1]} : vector<11x128xf32> to vector<10x128xf32>
    %2 = vector.extract_strided_slice %0 {offsets = [10, 0], sizes = [1, 128], strides = [1, 1]} : vector<11x128xf32> to vector<1x128xf32>
    %cst = arith.constant dense<0xFF800000> : vector<128xf32>
    %3 = vector.multi_reduction <maximumf>, %1, %cst [0] : vector<10x128xf32> to vector<128xf32>
    %4 = vector.shape_cast %3 : vector<128xf32> to vector<1x128xf32>
    %5 = vector.broadcast %4 : vector<1x128xf32> to vector<10x128xf32>
    %6 = arith.subf %1, %5 : vector<10x128xf32>
    %7 = math.exp %6 : vector<10x128xf32>
    %cst_1 = arith.constant dense<0.000000e+00> : vector<128xf32>
    %8 = vector.multi_reduction <add>, %7, %cst_1 [0] : vector<10x128xf32> to vector<128xf32>
    %9 = vector.shape_cast %8 : vector<128xf32> to vector<1x128xf32>
    %10 = math.log %9 : vector<1x128xf32>
    %11 = arith.addf %4, %10 : vector<1x128xf32>
    %c0_2 = arith.constant 0 : index
    %c0_3 = arith.constant 0 : index
    %12 = vector.load %arg2[%c0_2, %c0_3] : memref<1x128xi32, #tpu.memory_space<vmem>>, vector<1x128xi32>
    %13 = tpu.iota {dimensions = array<i32: 0>} : vector<10x128xi32>
    %14 = vector.broadcast %12 : vector<1x128xi32> to vector<10x128xi32>
    %15 = arith.cmpi eq, %13, %14 : vector<10x128xi32>
    %cst_4 = arith.constant 0.000000e+00 : f32
    %16 = vector.broadcast %cst_4 : f32 to vector<10x128xf32>
    %17 = arith.select %15, %1, %16 : vector<10x128xi1>, vector<10x128xf32>
    %cst_5 = arith.constant dense<0.000000e+00> : vector<128xf32>
    %18 = vector.multi_reduction <add>, %17, %cst_5 [0] : vector<10x128xf32> to vector<128xf32>
    %19 = vector.shape_cast %18 : vector<128xf32> to vector<1x128xf32>
    %20 = arith.subf %11, %19 : vector<1x128xf32>
    %cst_6 = arith.constant 5.000000e-01 : f32
    %21 = vector.broadcast %cst_6 : f32 to vector<1x128xf32>
    %22 = arith.mulf %21, %2 : vector<1x128xf32>
    %23 = arith.addf %20, %22 : vector<1x128xf32>
    %c0_7 = arith.constant 0 : index
    %c0_8 = arith.constant 0 : index
    %24 = vector.load %arg3[%c0_7, %c0_8] : memref<1x128xf32, #tpu.memory_space<vmem>>, vector<1x128xf32>
    tpu.vector_store %arg3[%c0_7, %c0_8], %23 {strides = array<i32>} : memref<1x128xf32, #tpu.memory_space<vmem>>, vector<1x128xf32>,
    return
  }
  func.func @transform_0(%arg0: i32) -> (i32, i32) {
    %c0_i32 = arith.constant 0 : i32
    %c0_i32_0 = arith.constant 0 : i32
    return %c0_i32, %arg0 : i32, i32
  }
  func.func @transform_1(%arg0: i32) -> (i32, i32) {
    %c0_i32 = arith.constant 0 : i32
    %c0_i32_0 = arith.constant 0 : i32
    return %arg0, %c0_i32 : i32, i32
  }
  func.func @transform_2(%arg0: i32) -> (i32, i32) {
    %c0_i32 = arith.constant 0 : i32
    %c0_i32_0 = arith.constant 0 : i32
    return %arg0, %c0_i32 : i32, i32
  }
}

</mosaic_0001>

<bundles_post_ra>
// kernel: tpu_custom_call.1
= control target key start
LH: loop header
LB: loop body
LE: loop exit
PB: predicated region body
PF: predicated region fallthrough
CT: control target
= control target key end

     0   :  { %vm14_vm0 = vcmask 1041408   ;;  %s139_s0 = inlined_call_operand.vmem [shape: f32[11,8], index: 0, kind: input, shape index: {}]   ;;  %s140_s1 = inlined_call_operand.vmem [shape: s32[1,128], index: 1, kind: input, shape index: {}]   ;;  %s141_s2 = inlined_call_operand.hbm [shape: f32[1,128], index: 2, kind: output, shape index: {}]  }
   0x1   :  { %v12_v0 = vld [vmem:[%s139_s0] sm:$0xff]  ;;  %v13_v1 = vld [vmem:[%s139_s0 + $0x8] sm:$0x7] }
   0x2   :  { %v15_v2 = vsel %vm14_vm0, %v13_v1, -inf }
   0x3   :  { %7 = vsyncpa [#allocation3], 0  ;;  %v16_v3 = vmax.f32 %v12_v0, %v15_v2  ;;  %v41_v14 = vlaneseq  ;;  %v78_v17 = vld [vmem:[%s140_s1] ss:$0 sm:$0xff]  ;;  %v61_v41 = vmul.f32 0.5, %v13_v1  ;;  %s108_s1 = smov [#allocation2]  }
   0x4   :  { %s70_s14 = sshll.u32 %s108_s1, 4  ;;  %s71_s14 = int_to_ptr.vmem [resolvable:$true] %s70_s14 }
   0x5   :  { %v17_v4 = vrot.slane %v16_v3, 4  ;;  %v42_v15 = vshrl.u32 %v41_v14, 7  ;;  %s86_s15 = scalar_lea.vmem %s71_s14, 16  ;;  %s90_s16 = scalar_lea.vmem %s71_s14, 32 }
   0x6   :  { %p87_p0 = scmp.ne.s32.totalorder %s71_s14, %s86_s15  ;;  %p91_p1 = scmp.lt.s32.totalorder %s71_s14, %s71_s14 }
   0x7   :  { %v18_v5 = vmax.f32 %v16_v3, %v17_v4  ;;  %v43_v16 = vadd.s32 8, %v42_v15  ;;  %vm48_vm2 = vcmp.eq.s32.totalorder %v42_v15, %v78_v17  ;;  %p92_p2 = scmp.lt.s32.totalorder %s90_s16, %s86_s15 }
   0x8   :  { %v50_v23 = vsel %vm48_vm2, %v12_v0, 0.0 }
   0x9   :  { %v19_v6 = vrot.slane %v18_v5, 2  ;;  %vm49_vm1 = vcmp.eq.s32.totalorder %v43_v16, %v78_v17  ;;  %p93_p3 = por %p92_p2, %p91_p1 }
   0xa   :  { %v51_v20 = vsel %vm49_vm1, %v13_v1, 0.0 }
   0xb   :  { %v20_v7 = vmax.f32 %v18_v5, %v19_v6  ;;  %v52_v24 = vsel %vm14_vm0, %v51_v20, 0.0  ;;  %p94_p4 = pnand %p93_p3, %p87_p0 }
   0xc   :  { %v53_v27 = vadd.f32 %v52_v24, %v50_v23 }
   0xd   :  { %v21_v8 = vrot.slane %v20_v7, 1 }
   0xe   :  { %v54_v30 = vrot.slane %v53_v27, 4 }
   0xf   :  { %v22_v9 = vmax.f32 %v20_v7, %v21_v8 }
  0x10   :  { %v55_v33 = vadd.f32 %v54_v30, %v53_v27 }
  0x11   :  { %v23_v10 = vsub.f32 %v12_v0, %v22_v9  ;;  %v24_v11 = vsub.f32 %v13_v1, %v22_v9 }
  0x12   :  { %v56_v34 = vrot.slane %v55_v33, 2 }
  0x13   :  { %v25_v12 = vmul.f32 1.442695, %v23_v10  ;;  %v27_v13 = vmul.f32 1.442695, %v24_v11 }
  0x14   :  { %v57_v35 = vadd.f32 %v56_v34, %v55_v33 }
  0x15   :  { %80 = vpow2.f32 %v25_v12 }
  0x16   :  { %82 = vpow2.f32 %v27_v13  ;;  %v58_v36 = vrot.slane %v57_v35, 1 }
  0x18   :  { %v59_v39 = vadd.f32 %v58_v36, %v57_v35 }
  0x22   :  { %v81_v18 = vpop.eup %80 }
  0x23   :  { %v83_v19 = vpop.eup %82 }
  0x24   :  { %v29_v21 = vsel %vm14_vm0, %v83_v19, 0.0 }
  0x25   :  { %v30_v22 = vadd.f32 %v81_v18, %v29_v21 }
  0x27   :  { %v31_v25 = vrot.slane %v30_v22, 4 }
  0x29   :  { %v32_v26 = vadd.f32 %v31_v25, %v30_v22 }
  0x2b   :  { %v33_v28 = vrot.slane %v32_v26, 2 }
  0x2d   :  { %v34_v29 = vadd.f32 %v33_v28, %v32_v26 }
  0x2f   :  { %v35_v31 = vrot.slane %v34_v29, 1 }
  0x31   :  { %v36_v32 = vadd.f32 %v35_v31, %v34_v29 }
  0x33   :  { %84 = vlog2.f32 %v36_v32 }
  0x40   :  { %v85_v37 = vpop.eup %84 }
  0x41   :  { %v38_v38 = vmul.f32 0.6931472, %v85_v37 }
  0x43   :  { %v39_v40 = vadd.f32 %v38_v38, %v22_v9 }
  0x45   :  { %v60_v42 = vsub.f32 %v39_v40, %v59_v39 }
  0x47   :  { %v62_v43 = vadd.f32 %v61_v41, %v60_v42 }
  0x49   :  { %63 = vst [vmem:[#allocation2 - $0x2] sm:$0x4] %v62_v43 }
  0x4a   :  { %97 = shalt.err (!%p94_p4)
}
  0x4b   :  { %73 = dma.vmem_to_hbm [thread:$0]  %s71_s14, 16, %s141_s2, [#allocation3]  }
  0x4c   :  { %106 = dma.done.wait [#allocation3], 16  }
  0x4d   :  { %107 = vsyncadd [#allocation3], 4294967280 }
  0x4e   :  { %77 = vsyncpa [#allocation3], 1 }

</bundles_post_ra>
